<compile_context>
chip_gen: v7x
topology: tpu7x:2x2x1
jax: 0.10.0
libtpu: 0.0.40
codegen_flags: <defaults>
</compile_context>

<pallas_src>
import math
from functools import partial

import jax
import jax.numpy as jnp
from jax.experimental import pallas as pl
from jax.experimental.pallas import tpu as pltpu

LN_EPS = 1e-5        # nn.LayerNorm default eps
TEMPERATURE = 0.7
ROUTER_EPS = 1e-6
CAPACITY_FACTOR = 2.0

_SQRT_2_OVER_PI = 0.7978845608028654

# Cached decision: does this Pallas build accept pl.Buffered(1) on constant
# operands?  None = unknown, True/False after the first pallas_call.
_SINGLE_BUFFER_OK = None


def _round_up(n, m):
    return ((n + m - 1) // m) * m


def router_mlp_kernel(x_ref, g_ref, b_ref, w1_ref, b1_ref, w2_ref, b2_ref,
                      o_ref):
    x = x_ref[...].astype(jnp.float32)

    # LayerNorm over the hidden dim (biased variance, eps = 1e-5), f32 math.
    mean = jnp.mean(x, axis=-1, keepdims=True)
    var = jnp.mean(jnp.square(x - mean), axis=-1, keepdims=True)
    xn = (x - mean) * jax.lax.rsqrt(var + LN_EPS)
    xn = xn * g_ref[...] + b_ref[...]

    # Linear(H -> H2p): bf16 x bf16 with f32 accumulation on the MXU.
    h = jnp.dot(xn.astype(jnp.bfloat16), w1_ref[...],
                preferred_element_type=jnp.float32) + b1_ref[...]

    # GELU (tanh approximation): tanh runs on the EUP slot, keeping the VALU
    # slot free for the LN / epilogue element-wise work.
    # TODO(synk): nn.GELU() default is the exact erf form; tanh approx differs
    # by <~1e-3 which is below the bf16 matmul noise floor here.
    h = 0.5 * h * (1.0 + jnp.tanh(_SQRT_2_OVER_PI *
                                  (h + 0.044715 * h * h * h)))

    # Linear(H2p -> Ep) + temperature + clamp.  Ep is a 128-lane multiple so
    # the epilogue and the stores are lane-dense.
    logits = jnp.dot(h.astype(jnp.bfloat16), w2_ref[...],
                     preferred_element_type=jnp.float32) + b2_ref[...]
    logits = logits * (1.0 / TEMPERATURE)
    logits = jnp.clip(logits, -50.0, 50.0)

    o_ref[...] = logits.astype(o_ref.dtype)


def router_logits_pallas(x_flat, gamma2, beta2, w1_t, b1_2, w2_t, b2_2,
                         num_experts, *, tm=256):
    """x_flat: (N, H) -> (N, num_experts) router logits (already /temp, clamped)."""
    global _SINGLE_BUFFER_OK

    N, H = x_flat.shape
    H2p = w1_t.shape[1]
    Ep = w2_t.shape[1]

    # Token tile: as large as reasonable (256 rows), but keep >= 2 grid steps
    # so the "parallel" axis can be sharded across both v7x TensorCores.
    if N <= 8:
        tm_eff = N                       # block == full dim (no (8,128) issue)
    else:
        tm_eff = min(tm, _round_up(N, 8))
        if pl.cdiv(N, tm_eff) < 2:
            tm_eff = max(8, _round_up(pl.cdiv(N, 2), 8))
    grid = (pl.cdiv(N, tm_eff),)

    # VMEM budget: double-buffered x / out tiles, bf16 weights (counted as
    # double-buffered worst case), f32 intermediates; clamp to v7x's 64 MiB.
    est = (2 * tm_eff * H * 4 + 2 * tm_eff * Ep * 4
           + 2 * (H * H2p + H2p * Ep) * 2
           + 4 * tm_eff * (H + H2p + Ep) * 4
           + 4 * (2 * H + H2p + Ep) * 4)
    vmem_limit = int(min(max(est, 32 * 1024 * 1024), 64 * 1024 * 1024))

    out_shape = jax.ShapeDtypeStruct((N, Ep), jnp.float32)

    def build(single_buffer_weights):
        const_kw = ({"pipeline_mode": pl.Buffered(1)}
                    if single_buffer_weights else {})

        def const_spec(shape):
            return pl.BlockSpec(shape, lambda i: (0, 0), **const_kw)

        return pl.pallas_call(
            router_mlp_kernel,
            out_shape=out_shape,
            grid_spec=pltpu.PrefetchScalarGridSpec(
                num_scalar_prefetch=0,
                grid=grid,
                in_specs=[
                    pl.BlockSpec((tm_eff, H), lambda i: (i, 0)),  # x tile
                    const_spec((1, H)),        # LN gamma
                    const_spec((1, H)),        # LN beta
                    const_spec((H, H2p)),      # W1^T (bf16, padded)
                    const_spec((1, H2p)),      # b1
                    const_spec((H2p, Ep)),     # W2^T (bf16, padded)
                    const_spec((1, Ep)),       # b2
                ],
                out_specs=pl.BlockSpec((tm_eff, Ep), lambda i: (i, 0)),
            ),
            compiler_params=pltpu.CompilerParams(
                dimension_semantics=("parallel",),
                vmem_limit_bytes=vmem_limit,
            ),
        )

    args = (x_flat, gamma2, beta2, w1_t, b1_2, w2_t, b2_2)

    if _SINGLE_BUFFER_OK is False:
        out = build(False)(*args)
    elif _SINGLE_BUFFER_OK is True:
        out = build(True)(*args)
    else:
        try:
            out = build(True)(*args)
            jax.block_until_ready(out)
            _SINGLE_BUFFER_OK = True
        except Exception:
            # pl.Buffered(1) (single-buffered constant operands) is not
            # accepted by every Pallas version; fall back (and remember) the
            # default double-buffering path.
            _SINGLE_BUFFER_OK = False
            out = build(False)(*args)

    return out[:, :num_experts]


def init_params(key, hidden_size, num_experts):
    """Deterministic init matching _init_weights (kaiming_normal fan_in/relu)."""
    h2 = hidden_size // 2
    k1, k2 = jax.random.split(key)
    gamma = jnp.ones((hidden_size,), jnp.float32)
    beta = jnp.zeros((hidden_size,), jnp.float32)
    w1 = jax.random.normal(k1, (h2, hidden_size), jnp.float32) * math.sqrt(
        2.0 / hidden_size)                       # torch layout (out, in)
    b1 = jnp.zeros((h2,), jnp.float32)
    w2 = jax.random.normal(k2, (num_experts, h2), jnp.float32) * math.sqrt(
        2.0 / h2)
    b2 = jnp.zeros((num_experts,), jnp.float32)
    return gamma, beta, w1, b1, w2, b2


def prepare_params(gamma, beta, w1, b1, w2, b2):
    """One-time repack for the kernel: transpose, zero-pad H/2 and E to
    128-lane multiples, store matmul weights in bf16 (LN params / biases f32).
    Padding is exact: padded hidden features are GELU(0)=0 and the padded
    expert columns are sliced off in the wrapper."""
    H = gamma.shape[0]
    H2 = w1.shape[0]
    E = w2.shape[0]
    H2p = _round_up(H2, 128)
    Ep = _round_up(E, 128)

    w1_t = jnp.zeros((H, H2p), jnp.bfloat16).at[:, :H2].set(
        w1.T.astype(jnp.bfloat16))
    b1p = jnp.zeros((1, H2p), jnp.float32).at[:, :H2].set(b1.reshape(1, H2))
    w2_t = jnp.zeros((H2p, Ep), jnp.bfloat16).at[:H2, :E].set(
        w2.T.astype(jnp.bfloat16))
    b2p = jnp.zeros((1, Ep), jnp.float32).at[:, :E].set(b2.reshape(1, E))

    return (gamma.reshape(1, H).astype(jnp.float32),
            beta.reshape(1, H).astype(jnp.float32),
            w1_t, b1p, w2_t, b2p)


@partial(jax.jit, static_argnames=("top_k", "num_experts", "capacity"))
def _routing_bookkeeping(logits_flat, *, top_k, num_experts, capacity):
    """Top-k -> softmax -> scatter -> per-expert capacity drop -> normalize ->
    KL load-balancing loss.  All static-shaped; one fused XLA program."""
    N = logits_flat.shape[0]

    topv, topi = jax.lax.top_k(logits_flat, top_k)             # (N, k)
    sm = jax.nn.softmax(topv, axis=-1)
    onehot = jax.nn.one_hot(topi, num_experts, dtype=logits_flat.dtype)
    masks = jnp.einsum('nk,nke->ne', sm, onehot)               # scatter

    # per-expert capacity enforcement (keep top-`capacity` tokens per column)
    col_sum = masks.sum(axis=0)                                # (E,)
    k_cap = max(min(capacity, N), 0)
    if k_cap > 0:
        colT = masks.T                                         # (E, N)
        top_vals, top_idx = jax.lax.top_k(colT, k_cap)
        keptT = jnp.zeros_like(colT).at[
            jnp.arange(num_experts)[:, None], top_idx].set(top_vals)
        kept = keptT.T
    else:
        kept = jnp.zeros_like(masks)
    over = col_sum > capacity
    masks = jnp.where(over[None, :], kept, masks)
    expert_count = jnp.where(over, kept.sum(axis=0), col_sum)

    # row-normalize masks
    row_sum = jnp.maximum(masks.sum(axis=-1, keepdims=True), ROUTER_EPS)
    masks = masks / row_sum

    # load-balancing KL loss (F.kl_div, reduction='batchmean' over E)
    usage = expert_count / jnp.maximum(expert_count.sum(), ROUTER_EPS)
    target = jnp.full_like(usage, 1.0 / num_experts)
    log_usage = jnp.log(jnp.maximum(usage, ROUTER_EPS))
    kl = jnp.sum(target * (jnp.log(target) - log_usage)) / num_experts
    loss = 0.01 * kl

    return masks, usage, loss


def attentive_router_forward(x, kernel_params, top_k, num_experts):
    B, S, H = x.shape
    top_k = min(top_k, num_experts)
    N = B * S

    # ---- hot path: fused Pallas router MLP ----
    logits_flat = router_logits_pallas(x.reshape(N, H), *kernel_params,
                                       num_experts)
    expert_weights = logits_flat.reshape(B, S, num_experts)

    # ---- routing bookkeeping (data-dependent, tiny (N, E); jitted JAX) ----
    capacity = int(CAPACITY_FACTOR * B * S * top_k / num_experts)
    masks, usage, loss = _routing_bookkeeping(
        logits_flat, top_k=top_k, num_experts=num_experts, capacity=capacity)

    return {
        'weights': expert_weights,
        'masks': masks.reshape(B, S, num_experts),
        'loss': loss,
        'expert_usage': usage,
    }


if __name__ == "__main__":
    B, S, H, E, TOP_K = 2, 8, 32, 4, 2
    key = jax.random.PRNGKey(0)
    kx, kp = jax.random.split(key)
    x = jax.random.normal(kx, (B, S, H), jnp.float32)
    raw = init_params(kp, H, E)
    params = prepare_params(*raw)

    out = attentive_router_forward(x, params, TOP_K, E)
    jax.block_until_ready(out)

    assert out['weights'].shape == (B, S, E)
    assert out['masks'].shape == (B, S, E)
    assert out['expert_usage'].shape == (E,)
    assert out['loss'].shape == ()
    print("KERNEL_OK")
</pallas_src>

<mosaic_0001>
module attributes {stable_mosaic.version = 11 : i64} {
  func.func @router_mlp_kernel(%arg0: i32, %arg1: memref<8x32xf32, #tpu.memory_space<vmem>>, %arg2: memref<1x32xf32, #tpu.memory_space<vmem>>, %arg3: memref<1x32xf32, #tpu.memory_space<vmem>>, %arg4: memref<32x128xbf16, #tpu.memory_space<vmem>>, %arg5: memref<1x128xf32, #tpu.memory_space<vmem>>, %arg6: memref<128x128xbf16, #tpu.memory_space<vmem>>, %arg7: memref<1x128xf32, #tpu.memory_space<vmem>>, %arg8: memref<8x128xf32, #tpu.memory_space<vmem>>) attributes {dimension_semantics = [#tpu.dimension_semantics<parallel>], iteration_bounds = array<i64: 2>, scalar_prefetch = 0 : i64, scratch_operands = 0 : i64, tpu.core_type = #tpu.core_type<tc>, window_params = [{transform_indices = @transform_0, window_bounds = array<i64: 8, 32>}, {pipeline_mode = #tpu.pipeline_mode<synchronous>, transform_indices = @transform_1, window_bounds = array<i64: 1, 32>}, {pipeline_mode = #tpu.pipeline_mode<synchronous>, transform_indices = @transform_2, window_bounds = array<i64: 1, 32>}, {pipeline_mode = #tpu.pipeline_mode<synchronous>, transform_indices = @transform_3, window_bounds = array<i64: 32, 128>}, {pipeline_mode = #tpu.pipeline_mode<synchronous>, transform_indices = @transform_4, window_bounds = array<i64: 1, 128>}, {pipeline_mode = #tpu.pipeline_mode<synchronous>, transform_indices = @transform_5, window_bounds = array<i64: 128, 128>}, {pipeline_mode = #tpu.pipeline_mode<synchronous>, transform_indices = @transform_6, window_bounds = array<i64: 1, 128>}, {transform_indices = @transform_7, window_bounds = array<i64: 8, 128>}]} {
    %c0 = arith.constant 0 : index
    %c0_0 = arith.constant 0 : index
    %0 = vector.load %arg1[%c0, %c0_0] : memref<8x32xf32, #tpu.memory_space<vmem>>, vector<8x32xf32>
    %cst = arith.constant dense<0.000000e+00> : vector<8xf32>
    %1 = vector.multi_reduction <add>, %0, %cst [1] : vector<8x32xf32> to vector<8xf32>
    %2 = vector.shape_cast %1 : vector<8xf32> to vector<8x1xf32>
    %cst_1 = arith.constant 3.200000e+01 : f32
    %3 = vector.broadcast %cst_1 : f32 to vector<8x1xf32>
    %4 = arith.divf %2, %3 : vector<8x1xf32>
    %5 = vector.broadcast %4 : vector<8x1xf32> to vector<8x32xf32>
    %6 = arith.subf %0, %5 : vector<8x32xf32>
    %7 = arith.mulf %6, %6 : vector<8x32xf32>
    %cst_2 = arith.constant dense<0.000000e+00> : vector<8xf32>
    %8 = vector.multi_reduction <add>, %7, %cst_2 [1] : vector<8x32xf32> to vector<8xf32>
    %9 = vector.shape_cast %8 : vector<8xf32> to vector<8x1xf32>
    %cst_3 = arith.constant 3.200000e+01 : f32
    %10 = vector.broadcast %cst_3 : f32 to vector<8x1xf32>
    %11 = arith.divf %9, %10 : vector<8x1xf32>
    %12 = vector.broadcast %4 : vector<8x1xf32> to vector<8x32xf32>
    %13 = arith.subf %0, %12 : vector<8x32xf32>
    %cst_4 = arith.constant 9.99999974E-6 : f32
    %14 = vector.broadcast %cst_4 : f32 to vector<8x1xf32>
    %15 = arith.addf %11, %14 : vector<8x1xf32>
    %16 = math.rsqrt %15 : vector<8x1xf32>
    %17 = vector.broadcast %16 : vector<8x1xf32> to vector<8x32xf32>
    %18 = arith.mulf %13, %17 : vector<8x32xf32>
    %c0_5 = arith.constant 0 : index
    %c0_6 = arith.constant 0 : index
    %19 = vector.load %arg2[%c0_5, %c0_6] : memref<1x32xf32, #tpu.memory_space<vmem>>, vector<1x32xf32>
    %20 = vector.broadcast %19 : vector<1x32xf32> to vector<8x32xf32>
    %21 = arith.mulf %18, %20 : vector<8x32xf32>
    %c0_7 = arith.constant 0 : index
    %c0_8 = arith.constant 0 : index
    %22 = vector.load %arg3[%c0_7, %c0_8] : memref<1x32xf32, #tpu.memory_space<vmem>>, vector<1x32xf32>
    %23 = vector.broadcast %22 : vector<1x32xf32> to vector<8x32xf32>
    %24 = arith.addf %21, %23 : vector<8x32xf32>
    %25 = arith.truncf %24 : vector<8x32xf32> to vector<8x32xbf16>
    %c0_9 = arith.constant 0 : index
    %c0_10 = arith.constant 0 : index
    %26 = vector.load %arg4[%c0_9, %c0_10] : memref<32x128xbf16, #tpu.memory_space<vmem>>, vector<32x128xbf16>
    %cst_11 = arith.constant dense<0.000000e+00> : vector<8x128xf32>
    %27 = tpu.matmul %25, %26, %cst_11 {dimension_numbers = #tpu.dot_dimension_numbers<[1], [0], [0], [1], [0, 0, 1, 1], [], []>} : vector<8x32xbf16>, vector<32x128xbf16>, vector<8x128xf32> -> vector<8x128xf32>
    %c0_12 = arith.constant 0 : index
    %c0_13 = arith.constant 0 : index
    %28 = vector.load %arg5[%c0_12, %c0_13] : memref<1x128xf32, #tpu.memory_space<vmem>>, vector<1x128xf32>
    %29 = vector.broadcast %28 : vector<1x128xf32> to vector<8x128xf32>
    %30 = arith.addf %27, %29 : vector<8x128xf32>
    %cst_14 = arith.constant 5.000000e-01 : f32
    %31 = vector.broadcast %cst_14 : f32 to vector<8x128xf32>
    %32 = arith.mulf %31, %30 : vector<8x128xf32>
    %cst_15 = arith.constant 4.471500e-02 : f32
    %33 = vector.broadcast %cst_15 : f32 to vector<8x128xf32>
    %34 = arith.mulf %33, %30 : vector<8x128xf32>
    %35 = arith.mulf %34, %30 : vector<8x128xf32>
    %36 = arith.mulf %35, %30 : vector<8x128xf32>
    %37 = arith.addf %30, %36 : vector<8x128xf32>
    %cst_16 = arith.constant 0.797884583 : f32
    %38 = vector.broadcast %cst_16 : f32 to vector<8x128xf32>
    %39 = arith.mulf %38, %37 : vector<8x128xf32>
    %40 = math.tanh %39 : vector<8x128xf32>
    %cst_17 = arith.constant 1.000000e+00 : f32
    %41 = vector.broadcast %cst_17 : f32 to vector<8x128xf32>
    %42 = arith.addf %41, %40 : vector<8x128xf32>
    %43 = arith.mulf %32, %42 : vector<8x128xf32>
    %44 = arith.truncf %43 : vector<8x128xf32> to vector<8x128xbf16>
    %c0_18 = arith.constant 0 : index
    %c0_19 = arith.constant 0 : index
    %45 = vector.load %arg6[%c0_18, %c0_19] : memref<128x128xbf16, #tpu.memory_space<vmem>>, vector<128x128xbf16>
    %cst_20 = arith.constant dense<0.000000e+00> : vector<8x128xf32>
    %46 = tpu.matmul %44, %45, %cst_20 {dimension_numbers = #tpu.dot_dimension_numbers<[1], [0], [0], [1], [0, 0, 1, 1], [], []>} : vector<8x128xbf16>, vector<128x128xbf16>, vector<8x128xf32> -> vector<8x128xf32>
    %c0_21 = arith.constant 0 : index
    %c0_22 = arith.constant 0 : index
    %47 = vector.load %arg7[%c0_21, %c0_22] : memref<1x128xf32, #tpu.memory_space<vmem>>, vector<1x128xf32>
    %48 = vector.broadcast %47 : vector<1x128xf32> to vector<8x128xf32>
    %49 = arith.addf %46, %48 : vector<8x128xf32>
    %cst_23 = arith.constant 1.42857146 : f32
    %50 = vector.broadcast %cst_23 : f32 to vector<8x128xf32>
    %51 = arith.mulf %49, %50 : vector<8x128xf32>
    %cst_24 = arith.constant -5.000000e+01 : f32
    %cst_25 = arith.constant 5.000000e+01 : f32
    %52 = vector.broadcast %cst_24 : f32 to vector<8x128xf32>
    %53 = arith.maximumf %52, %51 : vector<8x128xf32>
    %54 = vector.broadcast %cst_25 : f32 to vector<8x128xf32>
    %55 = arith.minimumf %54, %53 : vector<8x128xf32>
    %c0_26 = arith.constant 0 : index
    %c0_27 = arith.constant 0 : index
    %56 = vector.load %arg8[%c0_26, %c0_27] : memref<8x128xf32, #tpu.memory_space<vmem>>, vector<8x128xf32>
    tpu.vector_store %arg8[%c0_26, %c0_27], %55 {strides = array<i32>} : memref<8x128xf32, #tpu.memory_space<vmem>>, vector<8x128xf32>,
    return
  }
  func.func @transform_0(%arg0: i32) -> (i32, i32) {
    %c0_i32 = arith.constant 0 : i32
    %c0_i32_0 = arith.constant 0 : i32
    return %arg0, %c0_i32 : i32, i32
  }
  func.func @transform_1(%arg0: i32) -> (i32, i32) {
    %c0_i32 = arith.constant 0 : i32
    %c0_i32_0 = arith.constant 0 : i32
    %c0_i32_1 = arith.constant 0 : i32
    return %c0_i32, %c0_i32_0 : i32, i32
  }
  func.func @transform_2(%arg0: i32) -> (i32, i32) {
    %c0_i32 = arith.constant 0 : i32
    %c0_i32_0 = arith.constant 0 : i32
    %c0_i32_1 = arith.constant 0 : i32
    return %c0_i32, %c0_i32_0 : i32, i32
  }
  func.func @transform_3(%arg0: i32) -> (i32, i32) {
    %c0_i32 = arith.constant 0 : i32
    %c0_i32_0 = arith.constant 0 : i32
    %c0_i32_1 = arith.constant 0 : i32
    return %c0_i32, %c0_i32_0 : i32, i32
  }
  func.func @transform_4(%arg0: i32) -> (i32, i32) {
    %c0_i32 = arith.constant 0 : i32
    %c0_i32_0 = arith.constant 0 : i32
    %c0_i32_1 = arith.constant 0 : i32
    return %c0_i32, %c0_i32_0 : i32, i32
  }
  func.func @transform_5(%arg0: i32) -> (i32, i32) {
    %c0_i32 = arith.constant 0 : i32
    %c0_i32_0 = arith.constant 0 : i32
    %c0_i32_1 = arith.constant 0 : i32
    return %c0_i32, %c0_i32_0 : i32, i32
  }
  func.func @transform_6(%arg0: i32) -> (i32, i32) {
    %c0_i32 = arith.constant 0 : i32
    %c0_i32_0 = arith.constant 0 : i32
    %c0_i32_1 = arith.constant 0 : i32
    return %c0_i32, %c0_i32_0 : i32, i32
  }
  func.func @transform_7(%arg0: i32) -> (i32, i32) {
    %c0_i32 = arith.constant 0 : i32
    %c0_i32_0 = arith.constant 0 : i32
    return %arg0, %c0_i32 : i32, i32
  }
}

module attributes {stable_mosaic.version = 11 : i64} {
  func.func @router_mlp_kernel(%arg0: i32, %arg1: memref<8x32xf32, #tpu.memory_space<vmem>>, %arg2: memref<1x32xf32, #tpu.memory_space<vmem>>, %arg3: memref<1x32xf32, #tpu.memory_space<vmem>>, %arg4: memref<32x128xbf16, #tpu.memory_space<vmem>>, %arg5: memref<1x128xf32, #tpu.memory_space<vmem>>, %arg6: memref<128x128xbf16, #tpu.memory_space<vmem>>, %arg7: memref<1x128xf32, #tpu.memory_space<vmem>>, %arg8: memref<8x128xf32, #tpu.memory_space<vmem>>) attributes {dimension_semantics = [#tpu.dimension_semantics<parallel>], iteration_bounds = array<i64: 2>, scalar_prefetch = 0 : i64, scratch_operands = 0 : i64, tpu.core_type = #tpu.core_type<tc>, window_params = [{transform_indices = @transform_0, window_bounds = array<i64: 8, 32>}, {pipeline_mode = #tpu.pipeline_mode<synchronous>, transform_indices = @transform_1, window_bounds = array<i64: 1, 32>}, {pipeline_mode = #tpu.pipeline_mode<synchronous>, transform_indices = @transform_2, window_bounds = array<i64: 1, 32>}, {pipeline_mode = #tpu.pipeline_mode<synchronous>, transform_indices = @transform_3, window_bounds = array<i64: 32, 128>}, {pipeline_mode = #tpu.pipeline_mode<synchronous>, transform_indices = @transform_4, window_bounds = array<i64: 1, 128>}, {pipeline_mode = #tpu.pipeline_mode<synchronous>, transform_indices = @transform_5, window_bounds = array<i64: 128, 128>}, {pipeline_mode = #tpu.pipeline_mode<synchronous>, transform_indices = @transform_6, window_bounds = array<i64: 1, 128>}, {transform_indices = @transform_7, window_bounds = array<i64: 8, 128>}]} {
    %c0 = arith.constant 0 : index
    %c0_0 = arith.constant 0 : index
    %0 = vector.load %arg1[%c0, %c0_0] : memref<8x32xf32, #tpu.memory_space<vmem>>, vector<8x32xf32>
    %cst = arith.constant dense<0.000000e+00> : vector<8xf32>
    %1 = vector.multi_reduction <add>, %0, %cst [1] : vector<8x32xf32> to vector<8xf32>
    %2 = vector.shape_cast %1 : vector<8xf32> to vector<8x1xf32>
    %cst_1 = arith.constant 3.200000e+01 : f32
    %3 = vector.broadcast %cst_1 : f32 to vector<8x1xf32>
    %4 = arith.divf %2, %3 : vector<8x1xf32>
    %5 = vector.broadcast %4 : vector<8x1xf32> to vector<8x32xf32>
    %6 = arith.subf %0, %5 : vector<8x32xf32>
    %7 = arith.mulf %6, %6 : vector<8x32xf32>
    %cst_2 = arith.constant dense<0.000000e+00> : vector<8xf32>
    %8 = vector.multi_reduction <add>, %7, %cst_2 [1] : vector<8x32xf32> to vector<8xf32>
    %9 = vector.shape_cast %8 : vector<8xf32> to vector<8x1xf32>
    %cst_3 = arith.constant 3.200000e+01 : f32
    %10 = vector.broadcast %cst_3 : f32 to vector<8x1xf32>
    %11 = arith.divf %9, %10 : vector<8x1xf32>
    %12 = vector.broadcast %4 : vector<8x1xf32> to vector<8x32xf32>
    %13 = arith.subf %0, %12 : vector<8x32xf32>
    %cst_4 = arith.constant 9.99999974E-6 : f32
    %14 = vector.broadcast %cst_4 : f32 to vector<8x1xf32>
    %15 = arith.addf %11, %14 : vector<8x1xf32>
    %16 = math.rsqrt %15 : vector<8x1xf32>
    %17 = vector.broadcast %16 : vector<8x1xf32> to vector<8x32xf32>
    %18 = arith.mulf %13, %17 : vector<8x32xf32>
    %c0_5 = arith.constant 0 : index
    %c0_6 = arith.constant 0 : index
    %19 = vector.load %arg2[%c0_5, %c0_6] : memref<1x32xf32, #tpu.memory_space<vmem>>, vector<1x32xf32>
    %20 = vector.broadcast %19 : vector<1x32xf32> to vector<8x32xf32>
    %21 = arith.mulf %18, %20 : vector<8x32xf32>
    %c0_7 = arith.constant 0 : index
    %c0_8 = arith.constant 0 : index
    %22 = vector.load %arg3[%c0_7, %c0_8] : memref<1x32xf32, #tpu.memory_space<vmem>>, vector<1x32xf32>
    %23 = vector.broadcast %22 : vector<1x32xf32> to vector<8x32xf32>
    %24 = arith.addf %21, %23 : vector<8x32xf32>
    %25 = arith.truncf %24 : vector<8x32xf32> to vector<8x32xbf16>
    %c0_9 = arith.constant 0 : index
    %c0_10 = arith.constant 0 : index
    %26 = vector.load %arg4[%c0_9, %c0_10] : memref<32x128xbf16, #tpu.memory_space<vmem>>, vector<32x128xbf16>
    %cst_11 = arith.constant dense<0.000000e+00> : vector<8x128xf32>
    %27 = tpu.matmul %25, %26, %cst_11 {dimension_numbers = #tpu.dot_dimension_numbers<[1], [0], [0], [1], [0, 0, 1, 1], [], []>} : vector<8x32xbf16>, vector<32x128xbf16>, vector<8x128xf32> -> vector<8x128xf32>
    %c0_12 = arith.constant 0 : index
    %c0_13 = arith.constant 0 : index
    %28 = vector.load %arg5[%c0_12, %c0_13] : memref<1x128xf32, #tpu.memory_space<vmem>>, vector<1x128xf32>
    %29 = vector.broadcast %28 : vector<1x128xf32> to vector<8x128xf32>
    %30 = arith.addf %27, %29 : vector<8x128xf32>
    %cst_14 = arith.constant 5.000000e-01 : f32
    %31 = vector.broadcast %cst_14 : f32 to vector<8x128xf32>
    %32 = arith.mulf %31, %30 : vector<8x128xf32>
    %cst_15 = arith.constant 4.471500e-02 : f32
    %33 = vector.broadcast %cst_15 : f32 to vector<8x128xf32>
    %34 = arith.mulf %33, %30 : vector<8x128xf32>
    %35 = arith.mulf %34, %30 : vector<8x128xf32>
    %36 = arith.mulf %35, %30 : vector<8x128xf32>
    %37 = arith.addf %30, %36 : vector<8x128xf32>
    %cst_16 = arith.constant 0.797884583 : f32
    %38 = vector.broadcast %cst_16 : f32 to vector<8x128xf32>
    %39 = arith.mulf %38, %37 : vector<8x128xf32>
    %40 = math.tanh %39 : vector<8x128xf32>
    %cst_17 = arith.constant 1.000000e+00 : f32
    %41 = vector.broadcast %cst_17 : f32 to vector<8x128xf32>
    %42 = arith.addf %41, %40 : vector<8x128xf32>
    %43 = arith.mulf %32, %42 : vector<8x128xf32>
    %44 = arith.truncf %43 : vector<8x128xf32> to vector<8x128xbf16>
    %c0_18 = arith.constant 0 : index
    %c0_19 = arith.constant 0 : index
    %45 = vector.load %arg6[%c0_18, %c0_19] : memref<128x128xbf16, #tpu.memory_space<vmem>>, vector<128x128xbf16>
    %cst_20 = arith.constant dense<0.000000e+00> : vector<8x128xf32>
    %46 = tpu.matmul %44, %45, %cst_20 {dimension_numbers = #tpu.dot_dimension_numbers<[1], [0], [0], [1], [0, 0, 1, 1], [], []>} : vector<8x128xbf16>, vector<128x128xbf16>, vector<8x128xf32> -> vector<8x128xf32>
    %c0_21 = arith.constant 0 : index
    %c0_22 = arith.constant 0 : index
    %47 = vector.load %arg7[%c0_21, %c0_22] : memref<1x128xf32, #tpu.memory_space<vmem>>, vector<1x128xf32>
    %48 = vector.broadcast %47 : vector<1x128xf32> to vector<8x128xf32>
    %49 = arith.addf %46, %48 : vector<8x128xf32>
    %cst_23 = arith.constant 1.42857146 : f32
    %50 = vector.broadcast %cst_23 : f32 to vector<8x128xf32>
    %51 = arith.mulf %49, %50 : vector<8x128xf32>
    %cst_24 = arith.constant -5.000000e+01 : f32
    %cst_25 = arith.constant 5.000000e+01 : f32
    %52 = vector.broadcast %cst_24 : f32 to vector<8x128xf32>
    %53 = arith.maximumf %52, %51 : vector<8x128xf32>
    %54 = vector.broadcast %cst_25 : f32 to vector<8x128xf32>
    %55 = arith.minimumf %54, %53 : vector<8x128xf32>
    %c0_26 = arith.constant 0 : index
    %c0_27 = arith.constant 0 : index
    %56 = vector.load %arg8[%c0_26, %c0_27] : memref<8x128xf32, #tpu.memory_space<vmem>>, vector<8x128xf32>
    tpu.vector_store %arg8[%c0_26, %c0_27], %55 {strides = array<i32>} : memref<8x128xf32, #tpu.memory_space<vmem>>, vector<8x128xf32>,
    return
  }
  func.func @transform_0(%arg0: i32) -> (i32, i32) {
    %c0_i32 = arith.constant 0 : i32
    %c0_i32_0 = arith.constant 0 : i32
    return %arg0, %c0_i32 : i32, i32
  }
  func.func @transform_1(%arg0: i32) -> (i32, i32) {
    %c0_i32 = arith.constant 0 : i32
    %c0_i32_0 = arith.constant 0 : i32
    %c0_i32_1 = arith.constant 0 : i32
    return %c0_i32, %c0_i32_0 : i32, i32
  }
  func.func @transform_2(%arg0: i32) -> (i32, i32) {
    %c0_i32 = arith.constant 0 : i32
    %c0_i32_0 = arith.constant 0 : i32
    %c0_i32_1 = arith.constant 0 : i32
    return %c0_i32, %c0_i32_0 : i32, i32
  }
  func.func @transform_3(%arg0: i32) -> (i32, i32) {
    %c0_i32 = arith.constant 0 : i32
    %c0_i32_0 = arith.constant 0 : i32
    %c0_i32_1 = arith.constant 0 : i32
    return %c0_i32, %c0_i32_0 : i32, i32
  }
  func.func @transform_4(%arg0: i32) -> (i32, i32) {
    %c0_i32 = arith.constant 0 : i32
    %c0_i32_0 = arith.constant 0 : i32
    %c0_i32_1 = arith.constant 0 : i32
    return %c0_i32, %c0_i32_0 : i32, i32
  }
  func.func @transform_5(%arg0: i32) -> (i32, i32) {
    %c0_i32 = arith.constant 0 : i32
    %c0_i32_0 = arith.constant 0 : i32
    %c0_i32_1 = arith.constant 0 : i32
    return %c0_i32, %c0_i32_0 : i32, i32
  }
  func.func @transform_6(%arg0: i32) -> (i32, i32) {
    %c0_i32 = arith.constant 0 : i32
    %c0_i32_0 = arith.constant 0 : i32
    %c0_i32_1 = arith.constant 0 : i32
    return %c0_i32, %c0_i32_0 : i32, i32
  }
  func.func @transform_7(%arg0: i32) -> (i32, i32) {
    %c0_i32 = arith.constant 0 : i32
    %c0_i32_0 = arith.constant 0 : i32
    return %arg0, %c0_i32 : i32, i32
  }
}

</mosaic_0001>

<bundles_post_ra>
// kernel: tpu_custom_call.1
= control target key start
LH: loop header
LB: loop body
LE: loop exit
PB: predicated region body
PF: predicated region fallthrough
CT: control target
= control target key end

     0   :  { %12 = vsyncpa [#allocation3], 0  ;;  %s1262_s0 = inlined_call_operand.hbm [shape: f32[16,32], index: 0, kind: input, shape index: {}]   ;;  %s1263_s1 = inlined_call_operand.vmem [shape: f32[1,32], index: 1, kind: input, shape index: {}]   ;;  %s1264_s2 = inlined_call_operand.vmem [shape: f32[1,32], index: 2, kind: input, shape index: {}]   ;;  %s1265_s3 = inlined_call_operand.hbm [shape: bf16[32,128], index: 3, kind: input, shape index: {}]   ;;  %s1266_s4 = inlined_call_operand.vmem [shape: f32[1,128], index: 4, kind: input, shape index: {}]   ;;  %s1267_s5 = inlined_call_operand.hbm [shape: bf16[128,128], index: 5, kind: input, shape index: {}]   ;;  %s1268_s6 = inlined_call_operand.vmem [shape: f32[1,128], index: 6, kind: input, shape index: {}]   ;;  %s1269_s7 = inlined_call_operand.hbm [shape: f32[16,128], index: 7, kind: output, shape index: {}]  }
   0x1   :  { %14 = vsyncpa [#allocation3 + $0x1], 0 }
   0x2   :  { %15 = vsyncpa [#allocation6], 0 }
   0x3   :  { %16 = vsyncpa [#allocation4], 0 }
   0x4   :  { %18 = vsyncpa [#allocation4 + $0x1], 0  ;;  %s1014_s24 = smov 0   ;;  %s1016_s25 = smov 0  }
   0x5   :  { %s1018_s26 = smov 0   ;;  %s1020_s27 = smov 0  }
   0x6 LB: > { %s1035_s28 = sadd.s32 4294967295, %s964_s27   ;;  %s651_s29 = sadd.s32 4294967294, %s964_s27   ;;  %s964_s27 = sphi %s1020_s27, %s1289_s27   ;;  %s960_s26 = sphi %s1018_s26, %s1288_s26   ;;  %s956_s25 = sphi %s1016_s25, %s1287_s25   ;;  %s952_s24 = sphi %s1014_s24, %s1286_s24  }
   0x7   : > { %p44_p0 = scmp.ne.s32.totalorder %s956_s25, %s952_s24  ;;  %p1270_p1 = scmp.eq.s32.totalorder %s1035_s28, 0 }
   0x8   : > { %p200_p3 = scmp.eq.s32.totalorder %s651_s29, 1  ;;  %p652_p5 = scmp.ge.s32.totalorder %s964_s27, 1 }
   0x9   : > { %p1044_p4 = por %p1270_p1, %p44_p0  ;;  %p207_p7 = scmp.lt.s32.totalorder %s964_s27, 3 }
   0xa   : > { %p1049_p6 = por %p200_p3, %p44_p0  ;;  %s966_s10 = smov [#allocation5]  }
   0xb   : > { %s1273_s30 = scalar_select %p1044_p4, 1, 0 }
   0xc   : > { %s1274_s8 = scalar_select %p1049_p6, 1, 0 }
   0xd   : > { %p1054_p8 = pnand %p652_p5, %p207_p7  ;;  %s225_s11 = sshll.u32 %s966_s10, 4  ;;  %s1058_s11 = int_to_ptr.vmem [resolvable:$true] %s225_s11 }
   0xe   : > { %s967_s13 = smov [#allocation7]   ;;  %s808_s17 = scalar_lea.hbm %s1265_s3, 256 }
   0xf   : > { %p735_p9 = pneg %p1054_p8  ;;  %s241_s14 = sshll.u32 %s967_s13, 4  ;;  %s1069_s14 = int_to_ptr.vmem [resolvable:$true] %s241_s14 }
  0x10   : > { %p809_p12 = scmp.ne.s32.totalorder %s1265_s3, %s808_s17  ;;  %p815_p5 = scmp.lt.u32.totalorder %s808_s17, %s1265_s3 }
  0x11   : > { %p1065_p11 = pnand %p735_p9, %p1270_p1 }
  0x13   : > { %p810_p13 = pneg %p1065_p11 }
  0x15   : > { %p811_p0 = pnand %p810_p13, %p809_p12 }
  0x17   : > { %p812_p3 = pneg %p811_p0 }
  0x19   : > { %p817_p7 = pnand %p815_p5, %p812_p3 }
  0x1b   : > { %820 = shalt.err (!%p817_p7)
}
  0x1c   : > { %s821_s22 = scalar_lea.vmem %s1058_s11, 256  ;;  %p829_p2 = scmp.lt.s32.totalorder %s1058_s11, %s1058_s11 }
  0x1d   : > { %p822_p9 = scmp.ne.s32.totalorder %s1058_s11, %s821_s22  ;;  %p830_p12 = scmp.lt.s32.totalorder %s821_s22, %s821_s22 }
  0x1f   : > { %p824_p10 = pnand %p822_p9, %p810_p13  ;;  %p831_p0 = por %p830_p12, %p829_p2 }
  0x21   : > { %p825_p1 = pneg %p824_p10 }
  0x23   : > { %p832_p6 = pnand %p831_p0, %p825_p1 }
  0x25   : > { %835 = shalt.err (!%p832_p6)
}
  0x26   : > { %s968_s23 = smov 64   ;;  %s969_s29 = smov 4  }
  0x27   : > { %738 = dma.hbm_to_vmem [thread:$0]  (!%p1065_p11), %s1265_s3, 256, %s1058_s11, [#allocation6], %s968_s23, %s968_s23, %s969_s29  }
  0x28   : > { %s836_s17 = scalar_lea.hbm %s1267_s5, 1024 }
  0x29   : > { %p837_p2 = scmp.ne.s32.totalorder %s1267_s5, %s836_s17  ;;  %p843_p10 = scmp.lt.u32.totalorder %s836_s17, %s1267_s5 }
  0x2b   : > { %p839_p1 = pnand %p837_p2, %p810_p13 }
  0x2d   : > { %p840_p6 = pneg %p839_p1 }
  0x2f   : > { %p845_p3 = pnand %p843_p10, %p840_p6 }
  0x31   : > { %848 = shalt.err (!%p845_p3)
}
  0x32   : > { %s849_s11 = scalar_lea.vmem %s1069_s14, 1024  ;;  %p857_p12 = scmp.lt.s32.totalorder %s1069_s14, %s1069_s14 }
  0x33   : > { %p850_p5 = scmp.ne.s32.totalorder %s1069_s14, %s849_s11  ;;  %p858_p0 = scmp.lt.s32.totalorder %s849_s11, %s849_s11 }
  0x35   : > { %p852_p7 = pnand %p850_p5, %p810_p13  ;;  %p859_p2 = por %p858_p0, %p857_p12 }
  0x37   : > { %p853_p9 = pneg %p852_p7 }
  0x39   : > { %p860_p1 = pnand %p859_p2, %p853_p9 }
  0x3b   : > { %863 = shalt.err (!%p860_p1)
}
  0x3c   : > { %741 = dma.hbm_to_vmem [thread:$0]  (!%p1065_p11), %s1267_s5, 1024, %s1069_s14, [#allocation6], %s968_s23, %s968_s23, %s969_s29  }
  0x3d   : > { %s1124_s13 = sadd.s32 1, %s964_s27   ;;  %s31_s12 = sadd.s32 1, %s960_s26 }
  0x3e   : > { %s28_s15 = ssub.s32 %s964_s27, %s1124_s13  ;;  %p38_p13 = scmp.ne.s32.totalorder %s960_s26, %s956_s25 }
  0x3f   : > { %p29_p6 = scmp.eq.s32.totalorder %s28_s15, 0  ;;  %p39_p10 = scmp.eq.s32.totalorder %s964_s27, 0 }
  0x40   : > { %p1277_p3 = scmp.eq.s32.totalorder %s1035_s28, 1  ;;  %p752_p7 = scmp.lt.s32.totalorder %s964_s27, 2 }
  0x41   : > { %s1140_s17 = scalar_select %p29_p6, %s960_s26, %s31_s12  }
  0x42   : > { %p1134_p5 = por %p1277_p3, %p38_p13  ;;  %p40_p9 = por %p39_p10, %p38_p13 }
  0x43   : > { %s258_s18 = sand.u32 1, %s960_s26   ;;  %s657_s14 = sshll.u32 %s964_s27, 7 }
  0x44   : > { %s1278_s16 = scalar_select %p1134_p5, 1, 0 }
  0x45   : > { %s656_s19 = sshll.u32 %s258_s18, 3  ;;  %s1147_s20 = scalar_lea.hbm %s1262_s0, %s657_s14 }
  0x46   : > { %s262_s21 = scalar_lea.vmem [#allocation2], %s656_s19  ;;  %p1151_p11 = pnand %p752_p7, %p40_p9 }
  0x47   : > { %s269_s11 = sshll.u32 %s262_s21, 4  ;;  %s259_s10 = scalar_lea.sflag [#allocation3], %s258_s18  ;;  %s1149_s11 = int_to_ptr.vmem [resolvable:$true] %s269_s11 }
  0x48   : > { %s864_s12 = scalar_lea.hbm %s1147_s20, 128  ;;  %p866_p0 = pneg %p1151_p11 }
  0x49   : > { %p865_p12 = scmp.ne.s32.totalorder %s1147_s20, %s864_s12  ;;  %s869_s14 = scalar_lea.hbm %s1262_s0, 256 }
  0x4a   : > { %p870_p13 = scmp.lt.u32.totalorder %s1147_s20, %s1262_s0  ;;  %p871_p6 = scmp.lt.u32.totalorder %s869_s14, %s864_s12 }
  0x4b   : > { %p867_p2 = pnand %p866_p0, %p865_p12  ;;  %p873_p3 = scmp.lt.u32.totalorder %s864_s12, %s1147_s20 }
  0x4c   : > { %p872_p10 = por %p871_p6, %p870_p13 }
  0x4d   : > { %p868_p1 = pneg %p867_p2 }
  0x4e   : > { %p874_p7 = por %p873_p3, %p872_p10 }
  0x50   : > { %p875_p9 = pnand %p874_p7, %p868_p1 }
  0x52   : > { %878 = shalt.err (!%p875_p9)
}
  0x53   : > { %s879_s18 = scalar_lea.vmem %s1149_s11, 128  ;;  %s970_s21 = smov [#allocation2]  }
  0x54   : > { %p880_p12 = scmp.ne.s32.totalorder %s1149_s11, %s879_s18  ;;  %s884_s15 = sshll.u32 %s970_s21, 4  ;;  %s885_s15 = int_to_ptr.vmem [resolvable:$false] %s884_s15 }
  0x55   : > { %s886_s19 = scalar_lea.vmem %s885_s15, 256  ;;  %p887_p4 = scmp.lt.s32.totalorder %s1149_s11, %s885_s15 }
  0x56   : > { %p882_p2 = pnand %p880_p12, %p866_p0  ;;  %p888_p13 = scmp.lt.s32.totalorder %s886_s19, %s879_s18 }
  0x58   : > { %p883_p5 = pneg %p882_p2  ;;  %p889_p6 = por %p888_p13, %p887_p4 }
  0x5a   : > { %p890_p10 = pnand %p889_p6, %p883_p5 }
  0x5c   : > { %893 = shalt.err (!%p890_p10)
}
  0x5d   : > { %745 = dma.hbm_to_vmem [thread:$0]  (!%p1151_p11), %s1147_s20, 128, %s1149_s11, %s259_s10  }
  0x5e   : > { %278 = sbr.rel (%p1054_p8) target bundleno = 894 (0x37e), region = 48  ;;  %s1183_s12 = sand.u32 (!%p1054_p8), 1, %s956_s25  }
  0x5f   : > { %s659_s14 = sshll.u32 (!%p1054_p8), %s1183_s12, 3  ;;  %s281_s23 = scalar_lea.sflag (!%p1054_p8), [#allocation3], %s1183_s12 }
  0x60   : > { %s284_s29 = scalar_lea.vmem (!%p1054_p8), [#allocation2], %s659_s14  ;;  %p1280_p4 = scmp.ne.s32.totalorder (!%p1054_p8), %s1273_s30, 0 }
  0x65   : > { %939 = dma.done.wait (%p1280_p4), %s281_s23, 128  }
  0x66   : > { %941 = vsyncadd (%p1280_p4), %s281_s23, 4294967168  ;;  %p1281_p5 = scmp.eq.s32.totalorder %s1035_s28, 0 }
  0x68   : > { %943 = dma.done.wait (%p1281_p5), [#allocation6], 1280   ;;  %p1282_p8 = pmov %p1281_p5 }
  0x69   : > { %vm325_vm0 = vcmask 261120   ;;  %v324_v0 = vld [vmem:[%s284_s29] sm:$0xff]  ;;  %v794_v7 = vld [vmem:[#allocation5] sm:$0xff]   ;;  %v971_v8 = vmov 0.0   ;;  %v795_v9 = vld [vmem:[#allocation5 + $0x8] sm:$0xff]   ;;  %vm972_vm1 = vmmov 0  }
  0x6a   : > { %945 = vsyncadd (%p1282_p8), [#allocation6], 4294966016  ;;  %v326_v1 = vsel %vm325_vm0, %v324_v0, 0.0  ;;  %695 = vmatprep.subr.bf16.mxu0 %v971_v8  ;;  %703 = vmatprep.subr.bf16.mxu1 %v971_v8  ;;  %v796_v10 = vld [vmem:[#allocation7] sm:$0xff]   ;;  %v797_v21 = vld [vmem:[#allocation7 + $0x8] sm:$0xff]   ;;  %s680_s15 = sshll.u32 %s1035_s28, 7 }
  0x6b   : > { %327 = vadd.xlane.f32.xlu0 %v326_v1  ;;  %696 = vmatpush3.bf16.msra.mxu0 %v794_v7  ;;  %v663_v15 = vld [vmem:[%s1263_s1] ss:$0 sm:$0xff]  ;;  %v798_v22 = vld [vmem:[#allocation7 + $0x10] sm:$0xff]   ;;  %v799_v23 = vld [vmem:[#allocation7 + $0x18] sm:$0xff]   ;;  %s322_s19 = scalar_lea.vmem [#allocation8], %s659_s14  ;;  %s1218_s9 = scalar_lea.hbm %s1269_s7, %s680_s15 }
  0x6c   : > { %699 = vmatprep.mubr.msk.bf16.mxu0 %vm972_vm1, %v971_v8  ;;  %697 = vmatprep.subr.bf16.mxu0 %v971_v8  ;;  %v664_v17 = vld [vmem:[%s1264_s2] ss:$0 sm:$0xff]  ;;  %v801_v25 = vld [vmem:[#allocation7 + $0x28] sm:$0xff]   ;;  %v802_v26 = vld [vmem:[#allocation7 + $0x30] sm:$0xff]   ;;  %s562_s23 = sshll.u32 %s322_s19, 4  ;;  %s549_s20 = scalar_lea.sflag [#allocation4], %s1183_s12  ;;  %s1220_s23 = int_to_ptr.vmem [resolvable:$true] %s562_s23 }
  0x6d   : > { %719 = vmatprep.mubr.msk.bf16.mxu1 %vm972_vm1, %v971_v8  ;;  %704 = vmatpush3.bf16.msra.mxu1 %v796_v10  ;;  %v800_v24 = vld [vmem:[#allocation7 + $0x20] sm:$0xff]   ;;  %v803_v27 = vld [vmem:[#allocation7 + $0x38] sm:$0xff]   ;;  %s894_s11 = scalar_lea.vmem %s1220_s23, 128  ;;  %p1283_p0 = scmp.ne.s32.totalorder %s1278_s16, 0 }
  0x6e   : > { %705 = vmatprep.subr.bf16.mxu1 %v971_v8  ;;  %v665_v28 = vld [vmem:[%s1266_s4] ss:$0 sm:$0xff]  ;;  %p895_p11 = scmp.ne.s32.totalorder %s1220_s23, %s894_s11  ;;  %s973_s28 = smov [#allocation8]  }
  0x6f   : > { %698 = vmatpush3.bf16.msra.mxu0 %v795_v9  ;;  %v669_v44 = vld [vmem:[%s1268_s6] ss:$0 sm:$0xff]  ;;  %s898_s14 = sshll.u32 %s973_s28, 4  ;;  %s899_s14 = int_to_ptr.vmem [resolvable:$false] %s898_s14 }
  0x70   : > { %p896_p1 = pnand %p895_p11, %p1283_p0  ;;  %s900_s22 = scalar_lea.vmem %s899_s14, 256 }
  0x71   : > { %706 = vmatpush3.bf16.msra.mxu1 %v797_v21  ;;  %p901_p7 = scmp.lt.s32.totalorder %s1220_s23, %s899_s14  ;;  %p902_p9 = scmp.lt.s32.totalorder %s900_s22, %s894_s11 }
  0x72   : > { %707 = vmatprep.subr.bf16.mxu1 %v971_v8  ;;  %p897_p3 = pneg %p896_p1 }
  0x73   : > { %p903_p12 = por %p902_p9, %p901_p7 }
  0x75   : > { %708 = vmatpush3.bf16.msra.mxu1 %v798_v22  ;;  %p904_p2 = pnand %p903_p12, %p897_p3 }
  0x76   : > { %709 = vmatprep.subr.bf16.mxu1 %v971_v8 }
  0x79   : > { %710 = vmatpush3.bf16.msra.mxu1 %v799_v23 }
  0x7a   : > { %711 = vmatprep.subr.bf16.mxu1 %v971_v8 }
  0x7d   : > { %712 = vmatpush3.bf16.msra.mxu1 %v800_v24 }
  0x7e   : > { %713 = vmatprep.subr.bf16.mxu1 %v971_v8 }
  0x81   : > { %714 = vmatpush3.bf16.msra.mxu1 %v801_v25 }
  0x82   : > { %715 = vmatprep.subr.bf16.mxu1 %v971_v8 }
  0x85   : > { %716 = vmatpush3.bf16.msra.mxu1 %v802_v26 }
  0x86   : > { %717 = vmatprep.subr.bf16.mxu1 %v971_v8 }
  0x89   : > { %718 = vmatpush3.bf16.msra.mxu1 %v803_v27 }
  0xf8   : > { %v328_v2 = vpop.xlane.xlu0 %327 }
  0xf9   : > { %v330_v3 = vmul.f32 0.03125, %v328_v2 }
  0xfb   : > { %v331_v4 = vsub.f32 %v324_v0, %v330_v3 }
  0xfd   : > { %v332_v5 = vmul.f32 %v331_v4, %v331_v4 }
  0xff   : > { %v333_v6 = vsel %vm325_vm0, %v332_v5, 0.0 }
 0x100   : > { %334 = vadd.xlane.f32.xlu0 %v333_v6 }
 0x18d   : > { %v335_v11 = vpop.xlane.xlu0 %334 }
 0x18e   : > { %v336_v12 = vmul.f32 0.03125, %v335_v11 }
 0x190   : > { %v337_v13 = vadd.f32 1e-05, %v336_v12 }
 0x192   : > { %804 = vrsqrt.f32 %v337_v13 }
 0x19c   : > { %v805_v14 = vpop.eup %804 }
 0x19d   : > { %v339_v16 = vmul.f32 %v805_v14, %v331_v4 }
 0x19f   : > { %v347_v18 = vmul.f32 %v663_v15, %v339_v16 }
 0x1a1   : > { %v355_v19 = vadd.f32 %v664_v17, %v347_v18 }
 0x1a3   : > { %v356_v20 = vpack.c.bf16 %v355_v19, %v355_v19 }
 0x1a5   : > { %700 = vmatmul.mubr.msk.bf16.vlgmr.msra.gmra.mrb[0].mxu0 %vm325_vm0, %v356_v20 }
 0x278   : > { %v417_v29 = vpop.f32.mrb[0].mxu0 }
 0x279   : > { %v418_v30 = vadd.f32 %v665_v28, %v417_v29  ;;  %v701_v31 = vpop.f32.mrb[1].mxu0 }
 0x27a   : > { %v420_v32 = vpop.f32.mrb[2].mxu0 }
 0x27b   : > { %v424_v33 = vmul.f32 0.044715, %v418_v30  ;;  %v702_v34 = vpop.f32.mrb[3].mxu0  ;;  %v423_v40 = vmul.f32 0.5, %v418_v30 }
 0x27d   : > { %v425_v35 = vmul.f32 %v424_v33, %v418_v30 }
 0x27f   : > { %v426_v36 = vmul.f32 %v425_v35, %v418_v30 }
 0x281   : > { %v427_v37 = vadd.f32 %v426_v36, %v418_v30 }
 0x283   : > { %v428_v38 = vmul.f32 0.7978846, %v427_v37 }
 0x285   : > { %806 = vtanh.f32 %v428_v38 }
 0x28f   : > { %v807_v39 = vpop.eup %806 }
 0x290   : > { %v430_v41 = vadd.f32 1.0, %v807_v39 }
 0x292   : > { %v431_v42 = vmul.f32 %v430_v41, %v423_v40 }
 0x294   : > { %v432_v43 = vpack.c.bf16 %v431_v42, %v431_v42 }
 0x296   : > { %720 = vmatmul.mubr.bf16.vlgmr.msra.gmra.mrb[0].mxu1 %v432_v43 }
 0x369   : > { %v538_v45 = vpop.f32.mrb[0].mxu1 }
 0x36a   : > { %v539_v46 = vadd.f32 %v669_v44, %v538_v45  ;;  %v721_v47 = vpop.f32.mrb[1].mxu1 }
 0x36b   : > { %v541_v48 = vpop.f32.mrb[2].mxu1 }
 0x36c   : > { %v544_v49 = vmul.f32 1.4285715, %v539_v46  ;;  %v722_v50 = vpop.f32.mrb[3].mxu1 }
 0x36e   : > { %v678_v51 = vclamps-f32 %v544_v49, 50.0 }
 0x370   : > { %547 = vst [vmem:[%s322_s19] sm:$0xff] %v678_v51 }
 0x371   : > { %907 = shalt.err (!%p904_p2)
}
 0x372   : > { %s908_s12 = scalar_lea.hbm %s1218_s9, 128  ;;  %s912_s21 = scalar_lea.hbm %s1269_s7, 256 }
 0x373   : > { %p909_p13 = scmp.ne.s32.totalorder %s1218_s9, %s908_s12  ;;  %p913_p4 = scmp.lt.u32.totalorder %s1218_s9, %s1269_s7 }
 0x374   : > { %p914_p5 = scmp.lt.u32.totalorder %s912_s21, %s908_s12  ;;  %p916_p11 = scmp.lt.u32.totalorder %s908_s12, %s1218_s9 }
 0x375   : > { %p910_p6 = pnand %p909_p13, %p1283_p0 }
 0x376   : > { %p915_p8 = por %p914_p5, %p913_p4 }
 0x377   : > { %p911_p10 = pneg %p910_p6 }
 0x378   : > { %p917_p1 = por %p916_p11, %p915_p8 }
 0x37a   : > { %p918_p3 = pnand %p917_p1, %p911_p10 }
 0x37c   : > { %921 = shalt.err (!%p918_p3)
}
 0x37d   : > { %733 = dma.vmem_to_hbm [thread:$0]  (%p1283_p0), %s1220_s23, 128, %s1218_s9, %s549_s20  }
 0x37e PF: > { %s574_s29 = sand.u32 1, %s952_s24   ;;  %p1284_p7 = scmp.ne.s32.totalorder %s1274_s8, 0 }
 0x37f   : > { %p1285_p9 = scmp.ge.s32.totalorder %s964_s27, 2  ;;  %s575_s30 = scalar_lea.sflag [#allocation4], %s574_s29 }
 0x381   : > { %p747_p12 = pnand %p1285_p9, %p1284_p7 }
 0x383   : > { %947 = dma.done.wait (!%p747_p12), %s575_s30, 128  }
 0x384   : > { %949 = vsyncadd (!%p747_p12), %s575_s30, 4294967168  ;;  %p21_p2 = scmp.ge.s32.totalorder %s1124_s13, 4   ;;  %s1286_s24 = smov %s956_s25 }
 0x385   : > { %s1287_s25 = smov %s960_s26  ;;  %s1288_s26 = smov %s1140_s17 }
 0x386   : > { %s1289_s27 = smov %s1124_s13  ;;  %23 = sbr.rel (!%p21_p2) target bundleno = 6 (0x6), region = 101 }
 0x38d   :  { %580 = vsyncpa [#allocation3], 1 }
 0x38e   :  { %582 = vsyncpa [#allocation3 + $0x1], 1 }
 0x38f   :  { %583 = vsyncpa [#allocation6], 1 }
 0x390   :  { %584 = vsyncpa [#allocation4], 1 }
 0x391   :  { %586 = vsyncpa [#allocation4 + $0x1], 1 }

// kernel: tpu_custom_call.1
= control target key start
LH: loop header
LB: loop body
LE: loop exit
PB: predicated region body
PF: predicated region fallthrough
CT: control target
= control target key end

     0   :  { %12 = vsyncpa [#allocation3], 0  ;;  %s1262_s0 = inlined_call_operand.hbm [shape: f32[16,32], index: 0, kind: input, shape index: {}]   ;;  %s1263_s1 = inlined_call_operand.vmem [shape: f32[1,32], index: 1, kind: input, shape index: {}]   ;;  %s1264_s2 = inlined_call_operand.vmem [shape: f32[1,32], index: 2, kind: input, shape index: {}]   ;;  %s1265_s3 = inlined_call_operand.hbm [shape: bf16[32,128], index: 3, kind: input, shape index: {}]   ;;  %s1266_s4 = inlined_call_operand.vmem [shape: f32[1,128], index: 4, kind: input, shape index: {}]   ;;  %s1267_s5 = inlined_call_operand.hbm [shape: bf16[128,128], index: 5, kind: input, shape index: {}]   ;;  %s1268_s6 = inlined_call_operand.vmem [shape: f32[1,128], index: 6, kind: input, shape index: {}]   ;;  %s1269_s7 = inlined_call_operand.hbm [shape: f32[16,128], index: 7, kind: output, shape index: {}]  }
   0x1   :  { %14 = vsyncpa [#allocation3 + $0x1], 0 }
   0x2   :  { %15 = vsyncpa [#allocation6], 0 }
   0x3   :  { %16 = vsyncpa [#allocation4], 0 }
   0x4   :  { %18 = vsyncpa [#allocation4 + $0x1], 0  ;;  %s1014_s24 = smov 0   ;;  %s1016_s25 = smov 0  }
   0x5   :  { %s1018_s26 = smov 0   ;;  %s1020_s27 = smov 0  }
   0x6 LB: > { %s1035_s28 = sadd.s32 4294967295, %s964_s27   ;;  %s651_s29 = sadd.s32 4294967294, %s964_s27   ;;  %s964_s27 = sphi %s1020_s27, %s1289_s27   ;;  %s960_s26 = sphi %s1018_s26, %s1288_s26   ;;  %s956_s25 = sphi %s1016_s25, %s1287_s25   ;;  %s952_s24 = sphi %s1014_s24, %s1286_s24  }
   0x7   : > { %p44_p0 = scmp.ne.s32.totalorder %s956_s25, %s952_s24  ;;  %p1270_p1 = scmp.eq.s32.totalorder %s1035_s28, 0 }
   0x8   : > { %p200_p3 = scmp.eq.s32.totalorder %s651_s29, 1  ;;  %p652_p5 = scmp.ge.s32.totalorder %s964_s27, 1 }
   0x9   : > { %p1044_p4 = por %p1270_p1, %p44_p0  ;;  %p207_p7 = scmp.lt.s32.totalorder %s964_s27, 3 }
   0xa   : > { %p1049_p6 = por %p200_p3, %p44_p0  ;;  %s966_s10 = smov [#allocation5]  }
   0xb   : > { %s1273_s30 = scalar_select %p1044_p4, 1, 0 }
   0xc   : > { %s1274_s8 = scalar_select %p1049_p6, 1, 0 }
   0xd   : > { %p1054_p8 = pnand %p652_p5, %p207_p7  ;;  %s225_s11 = sshll.u32 %s966_s10, 4  ;;  %s1058_s11 = int_to_ptr.vmem [resolvable:$true] %s225_s11 }
   0xe   : > { %s967_s13 = smov [#allocation7]   ;;  %s808_s17 = scalar_lea.hbm %s1265_s3, 256 }
   0xf   : > { %p735_p9 = pneg %p1054_p8  ;;  %s241_s14 = sshll.u32 %s967_s13, 4  ;;  %s1069_s14 = int_to_ptr.vmem [resolvable:$true] %s241_s14 }
  0x10   : > { %p809_p12 = scmp.ne.s32.totalorder %s1265_s3, %s808_s17  ;;  %p815_p5 = scmp.lt.u32.totalorder %s808_s17, %s1265_s3 }
  0x11   : > { %p1065_p11 = pnand %p735_p9, %p1270_p1 }
  0x13   : > { %p810_p13 = pneg %p1065_p11 }
  0x15   : > { %p811_p0 = pnand %p810_p13, %p809_p12 }
  0x17   : > { %p812_p3 = pneg %p811_p0 }
  0x19   : > { %p817_p7 = pnand %p815_p5, %p812_p3 }
  0x1b   : > { %820 = shalt.err (!%p817_p7)
}
  0x1c   : > { %s821_s22 = scalar_lea.vmem %s1058_s11, 256  ;;  %p829_p2 = scmp.lt.s32.totalorder %s1058_s11, %s1058_s11 }
  0x1d   : > { %p822_p9 = scmp.ne.s32.totalorder %s1058_s11, %s821_s22  ;;  %p830_p12 = scmp.lt.s32.totalorder %s821_s22, %s821_s22 }
  0x1f   : > { %p824_p10 = pnand %p822_p9, %p810_p13  ;;  %p831_p0 = por %p830_p12, %p829_p2 }
  0x21   : > { %p825_p1 = pneg %p824_p10 }
  0x23   : > { %p832_p6 = pnand %p831_p0, %p825_p1 }
  0x25   : > { %835 = shalt.err (!%p832_p6)
}
  0x26   : > { %s968_s23 = smov 64   ;;  %s969_s29 = smov 4  }
  0x27   : > { %738 = dma.hbm_to_vmem [thread:$0]  (!%p1065_p11), %s1265_s3, 256, %s1058_s11, [#allocation6], %s968_s23, %s968_s23, %s969_s29  }
  0x28   : > { %s836_s17 = scalar_lea.hbm %s1267_s5, 1024 }
  0x29   : > { %p837_p2 = scmp.ne.s32.totalorder %s1267_s5, %s836_s17  ;;  %p843_p10 = scmp.lt.u32.totalorder %s836_s17, %s1267_s5 }
  0x2b   : > { %p839_p1 = pnand %p837_p2, %p810_p13 }
  0x2d   : > { %p840_p6 = pneg %p839_p1 }
  0x2f   : > { %p845_p3 = pnand %p843_p10, %p840_p6 }
  0x31   : > { %848 = shalt.err (!%p845_p3)
}
  0x32   : > { %s849_s11 = scalar_lea.vmem %s1069_s14, 1024  ;;  %p857_p12 = scmp.lt.s32.totalorder %s1069_s14, %s1069_s14 }
  0x33   : > { %p850_p5 = scmp.ne.s32.totalorder %s1069_s14, %s849_s11  ;;  %p858_p0 = scmp.lt.s32.totalorder %s849_s11, %s849_s11 }
  0x35   : > { %p852_p7 = pnand %p850_p5, %p810_p13  ;;  %p859_p2 = por %p858_p0, %p857_p12 }
  0x37   : > { %p853_p9 = pneg %p852_p7 }
  0x39   : > { %p860_p1 = pnand %p859_p2, %p853_p9 }
  0x3b   : > { %863 = shalt.err (!%p860_p1)
}
  0x3c   : > { %741 = dma.hbm_to_vmem [thread:$0]  (!%p1065_p11), %s1267_s5, 1024, %s1069_s14, [#allocation6], %s968_s23, %s968_s23, %s969_s29  }
  0x3d   : > { %s1124_s13 = sadd.s32 1, %s964_s27   ;;  %s31_s12 = sadd.s32 1, %s960_s26 }
  0x3e   : > { %s28_s15 = ssub.s32 %s964_s27, %s1124_s13  ;;  %p38_p13 = scmp.ne.s32.totalorder %s960_s26, %s956_s25 }
  0x3f   : > { %p29_p6 = scmp.eq.s32.totalorder %s28_s15, 0  ;;  %p39_p10 = scmp.eq.s32.totalorder %s964_s27, 0 }
  0x40   : > { %p1277_p3 = scmp.eq.s32.totalorder %s1035_s28, 1  ;;  %p752_p7 = scmp.lt.s32.totalorder %s964_s27, 2 }
  0x41   : > { %s1140_s17 = scalar_select %p29_p6, %s960_s26, %s31_s12  }
  0x42   : > { %p1134_p5 = por %p1277_p3, %p38_p13  ;;  %p40_p9 = por %p39_p10, %p38_p13 }
  0x43   : > { %s258_s18 = sand.u32 1, %s960_s26   ;;  %s657_s14 = sshll.u32 %s964_s27, 7 }
  0x44   : > { %s1278_s16 = scalar_select %p1134_p5, 1, 0 }
  0x45   : > { %s656_s19 = sshll.u32 %s258_s18, 3  ;;  %s1147_s20 = scalar_lea.hbm %s1262_s0, %s657_s14 }
  0x46   : > { %s262_s21 = scalar_lea.vmem [#allocation2], %s656_s19  ;;  %p1151_p11 = pnand %p752_p7, %p40_p9 }
  0x47   : > { %s269_s11 = sshll.u32 %s262_s21, 4  ;;  %s259_s10 = scalar_lea.sflag [#allocation3], %s258_s18  ;;  %s1149_s11 = int_to_ptr.vmem [resolvable:$true] %s269_s11 }
  0x48   : > { %s864_s12 = scalar_lea.hbm %s1147_s20, 128  ;;  %p866_p0 = pneg %p1151_p11 }
  0x49   : > { %p865_p12 = scmp.ne.s32.totalorder %s1147_s20, %s864_s12  ;;  %s869_s14 = scalar_lea.hbm %s1262_s0, 256 }
  0x4a   : > { %p870_p13 = scmp.lt.u32.totalorder %s1147_s20, %s1262_s0  ;;  %p871_p6 = scmp.lt.u32.totalorder %s869_s14, %s864_s12 }
  0x4b   : > { %p867_p2 = pnand %p866_p0, %p865_p12  ;;  %p873_p3 = scmp.lt.u32.totalorder %s864_s12, %s1147_s20 }
  0x4c   : > { %p872_p10 = por %p871_p6, %p870_p13 }
  0x4d   : > { %p868_p1 = pneg %p867_p2 }
  0x4e   : > { %p874_p7 = por %p873_p3, %p872_p10 }
  0x50   : > { %p875_p9 = pnand %p874_p7, %p868_p1 }
  0x52   : > { %878 = shalt.err (!%p875_p9)
}
  0x53   : > { %s879_s18 = scalar_lea.vmem %s1149_s11, 128  ;;  %s970_s21 = smov [#allocation2]  }
  0x54   : > { %p880_p12 = scmp.ne.s32.totalorder %s1149_s11, %s879_s18  ;;  %s884_s15 = sshll.u32 %s970_s21, 4  ;;  %s885_s15 = int_to_ptr.vmem [resolvable:$false] %s884_s15 }
  0x55   : > { %s886_s19 = scalar_lea.vmem %s885_s15, 256  ;;  %p887_p4 = scmp.lt.s32.totalorder %s1149_s11, %s885_s15 }
  0x56   : > { %p882_p2 = pnand %p880_p12, %p866_p0  ;;  %p888_p13 = scmp.lt.s32.totalorder %s886_s19, %s879_s18 }
  0x58   : > { %p883_p5 = pneg %p882_p2  ;;  %p889_p6 = por %p888_p13, %p887_p4 }
  0x5a   : > { %p890_p10 = pnand %p889_p6, %p883_p5 }
  0x5c   : > { %893 = shalt.err (!%p890_p10)
}
  0x5d   : > { %745 = dma.hbm_to_vmem [thread:$0]  (!%p1151_p11), %s1147_s20, 128, %s1149_s11, %s259_s10  }
  0x5e   : > { %278 = sbr.rel (%p1054_p8) target bundleno = 894 (0x37e), region = 48  ;;  %s1183_s12 = sand.u32 (!%p1054_p8), 1, %s956_s25  }
  0x5f   : > { %s659_s14 = sshll.u32 (!%p1054_p8), %s1183_s12, 3  ;;  %s281_s23 = scalar_lea.sflag (!%p1054_p8), [#allocation3], %s1183_s12 }
  0x60   : > { %s284_s29 = scalar_lea.vmem (!%p1054_p8), [#allocation2], %s659_s14  ;;  %p1280_p4 = scmp.ne.s32.totalorder (!%p1054_p8), %s1273_s30, 0 }
  0x65   : > { %939 = dma.done.wait (%p1280_p4), %s281_s23, 128  }
  0x66   : > { %941 = vsyncadd (%p1280_p4), %s281_s23, 4294967168  ;;  %p1281_p5 = scmp.eq.s32.totalorder %s1035_s28, 0 }
  0x68   : > { %943 = dma.done.wait (%p1281_p5), [#allocation6], 1280   ;;  %p1282_p8 = pmov %p1281_p5 }
  0x69   : > { %vm325_vm0 = vcmask 261120   ;;  %v324_v0 = vld [vmem:[%s284_s29] sm:$0xff]  ;;  %v794_v7 = vld [vmem:[#allocation5] sm:$0xff]   ;;  %v971_v8 = vmov 0.0   ;;  %v795_v9 = vld [vmem:[#allocation5 + $0x8] sm:$0xff]   ;;  %vm972_vm1 = vmmov 0  }
  0x6a   : > { %945 = vsyncadd (%p1282_p8), [#allocation6], 4294966016  ;;  %v326_v1 = vsel %vm325_vm0, %v324_v0, 0.0  ;;  %695 = vmatprep.subr.bf16.mxu0 %v971_v8  ;;  %703 = vmatprep.subr.bf16.mxu1 %v971_v8  ;;  %v796_v10 = vld [vmem:[#allocation7] sm:$0xff]   ;;  %v797_v21 = vld [vmem:[#allocation7 + $0x8] sm:$0xff]   ;;  %s680_s15 = sshll.u32 %s1035_s28, 7 }
  0x6b   : > { %327 = vadd.xlane.f32.xlu0 %v326_v1  ;;  %696 = vmatpush3.bf16.msra.mxu0 %v794_v7  ;;  %v663_v15 = vld [vmem:[%s1263_s1] ss:$0 sm:$0xff]  ;;  %v798_v22 = vld [vmem:[#allocation7 + $0x10] sm:$0xff]   ;;  %v799_v23 = vld [vmem:[#allocation7 + $0x18] sm:$0xff]   ;;  %s322_s19 = scalar_lea.vmem [#allocation8], %s659_s14  ;;  %s1218_s9 = scalar_lea.hbm %s1269_s7, %s680_s15 }
  0x6c   : > { %699 = vmatprep.mubr.msk.bf16.mxu0 %vm972_vm1, %v971_v8  ;;  %697 = vmatprep.subr.bf16.mxu0 %v971_v8  ;;  %v664_v17 = vld [vmem:[%s1264_s2] ss:$0 sm:$0xff]  ;;  %v801_v25 = vld [vmem:[#allocation7 + $0x28] sm:$0xff]   ;;  %v802_v26 = vld [vmem:[#allocation7 + $0x30] sm:$0xff]   ;;  %s562_s23 = sshll.u32 %s322_s19, 4  ;;  %s549_s20 = scalar_lea.sflag [#allocation4], %s1183_s12  ;;  %s1220_s23 = int_to_ptr.vmem [resolvable:$true] %s562_s23 }
  0x6d   : > { %719 = vmatprep.mubr.msk.bf16.mxu1 %vm972_vm1, %v971_v8  ;;  %704 = vmatpush3.bf16.msra.mxu1 %v796_v10  ;;  %v800_v24 = vld [vmem:[#allocation7 + $0x20] sm:$0xff]   ;;  %v803_v27 = vld [vmem:[#allocation7 + $0x38] sm:$0xff]   ;;  %s894_s11 = scalar_lea.vmem %s1220_s23, 128  ;;  %p1283_p0 = scmp.ne.s32.totalorder %s1278_s16, 0 }
  0x6e   : > { %705 = vmatprep.subr.bf16.mxu1 %v971_v8  ;;  %v665_v28 = vld [vmem:[%s1266_s4] ss:$0 sm:$0xff]  ;;  %p895_p11 = scmp.ne.s32.totalorder %s1220_s23, %s894_s11  ;;  %s973_s28 = smov [#allocation8]  }
  0x6f   : > { %698 = vmatpush3.bf16.msra.mxu0 %v795_v9  ;;  %v669_v44 = vld [vmem:[%s1268_s6] ss:$0 sm:$0xff]  ;;  %s898_s14 = sshll.u32 %s973_s28, 4  ;;  %s899_s14 = int_to_ptr.vmem [resolvable:$false] %s898_s14 }
  0x70   : > { %p896_p1 = pnand %p895_p11, %p1283_p0  ;;  %s900_s22 = scalar_lea.vmem %s899_s14, 256 }
  0x71   : > { %706 = vmatpush3.bf16.msra.mxu1 %v797_v21  ;;  %p901_p7 = scmp.lt.s32.totalorder %s1220_s23, %s899_s14  ;;  %p902_p9 = scmp.lt.s32.totalorder %s900_s22, %s894_s11 }
  0x72   : > { %707 = vmatprep.subr.bf16.mxu1 %v971_v8  ;;  %p897_p3 = pneg %p896_p1 }
  0x73   : > { %p903_p12 = por %p902_p9, %p901_p7 }
  0x75   : > { %708 = vmatpush3.bf16.msra.mxu1 %v798_v22  ;;  %p904_p2 = pnand %p903_p12, %p897_p3 }
  0x76   : > { %709 = vmatprep.subr.bf16.mxu1 %v971_v8 }
  0x79   : > { %710 = vmatpush3.bf16.msra.mxu1 %v799_v23 }
  0x7a   : > { %711 = vmatprep.subr.bf16.mxu1 %v971_v8 }
  0x7d   : > { %712 = vmatpush3.bf16.msra.mxu1 %v800_v24 }
  0x7e   : > { %713 = vmatprep.subr.bf16.mxu1 %v971_v8 }
  0x81   : > { %714 = vmatpush3.bf16.msra.mxu1 %v801_v25 }
  0x82   : > { %715 = vmatprep.subr.bf16.mxu1 %v971_v8 }
  0x85   : > { %716 = vmatpush3.bf16.msra.mxu1 %v802_v26 }
  0x86   : > { %717 = vmatprep.subr.bf16.mxu1 %v971_v8 }
  0x89   : > { %718 = vmatpush3.bf16.msra.mxu1 %v803_v27 }
  0xf8   : > { %v328_v2 = vpop.xlane.xlu0 %327 }
  0xf9   : > { %v330_v3 = vmul.f32 0.03125, %v328_v2 }
  0xfb   : > { %v331_v4 = vsub.f32 %v324_v0, %v330_v3 }
  0xfd   : > { %v332_v5 = vmul.f32 %v331_v4, %v331_v4 }
  0xff   : > { %v333_v6 = vsel %vm325_vm0, %v332_v5, 0.0 }
 0x100   : > { %334 = vadd.xlane.f32.xlu0 %v333_v6 }
 0x18d   : > { %v335_v11 = vpop.xlane.xlu0 %334 }
 0x18e   : > { %v336_v12 = vmul.f32 0.03125, %v335_v11 }
 0x190   : > { %v337_v13 = vadd.f32 1e-05, %v336_v12 }
 0x192   : > { %804 = vrsqrt.f32 %v337_v13 }
 0x19c   : > { %v805_v14 = vpop.eup %804 }
 0x19d   : > { %v339_v16 = vmul.f32 %v805_v14, %v331_v4 }
 0x19f   : > { %v347_v18 = vmul.f32 %v663_v15, %v339_v16 }
 0x1a1   : > { %v355_v19 = vadd.f32 %v664_v17, %v347_v18 }
 0x1a3   : > { %v356_v20 = vpack.c.bf16 %v355_v19, %v355_v19 }
 0x1a5   : > { %700 = vmatmul.mubr.msk.bf16.vlgmr.msra.gmra.mrb[0].mxu0 %vm325_vm0, %v356_v20 }
 0x278   : > { %v417_v29 = vpop.f32.mrb[0].mxu0 }
 0x279   : > { %v418_v30 = vadd.f32 %v665_v28, %v417_v29  ;;  %v701_v31 = vpop.f32.mrb[1].mxu0 }
 0x27a   : > { %v420_v32 = vpop.f32.mrb[2].mxu0 }
 0x27b   : > { %v424_v33 = vmul.f32 0.044715, %v418_v30  ;;  %v702_v34 = vpop.f32.mrb[3].mxu0  ;;  %v423_v40 = vmul.f32 0.5, %v418_v30 }
 0x27d   : > { %v425_v35 = vmul.f32 %v424_v33, %v418_v30 }
 0x27f   : > { %v426_v36 = vmul.f32 %v425_v35, %v418_v30 }
 0x281   : > { %v427_v37 = vadd.f32 %v426_v36, %v418_v30 }
 0x283   : > { %v428_v38 = vmul.f32 0.7978846, %v427_v37 }
 0x285   : > { %806 = vtanh.f32 %v428_v38 }
 0x28f   : > { %v807_v39 = vpop.eup %806 }
 0x290   : > { %v430_v41 = vadd.f32 1.0, %v807_v39 }
 0x292   : > { %v431_v42 = vmul.f32 %v430_v41, %v423_v40 }
 0x294   : > { %v432_v43 = vpack.c.bf16 %v431_v42, %v431_v42 }
 0x296   : > { %720 = vmatmul.mubr.bf16.vlgmr.msra.gmra.mrb[0].mxu1 %v432_v43 }
 0x369   : > { %v538_v45 = vpop.f32.mrb[0].mxu1 }
 0x36a   : > { %v539_v46 = vadd.f32 %v669_v44, %v538_v45  ;;  %v721_v47 = vpop.f32.mrb[1].mxu1 }
 0x36b   : > { %v541_v48 = vpop.f32.mrb[2].mxu1 }
 0x36c   : > { %v544_v49 = vmul.f32 1.4285715, %v539_v46  ;;  %v722_v50 = vpop.f32.mrb[3].mxu1 }
 0x36e   : > { %v678_v51 = vclamps-f32 %v544_v49, 50.0 }
 0x370   : > { %547 = vst [vmem:[%s322_s19] sm:$0xff] %v678_v51 }
 0x371   : > { %907 = shalt.err (!%p904_p2)
}
 0x372   : > { %s908_s12 = scalar_lea.hbm %s1218_s9, 128  ;;  %s912_s21 = scalar_lea.hbm %s1269_s7, 256 }
 0x373   : > { %p909_p13 = scmp.ne.s32.totalorder %s1218_s9, %s908_s12  ;;  %p913_p4 = scmp.lt.u32.totalorder %s1218_s9, %s1269_s7 }
 0x374   : > { %p914_p5 = scmp.lt.u32.totalorder %s912_s21, %s908_s12  ;;  %p916_p11 = scmp.lt.u32.totalorder %s908_s12, %s1218_s9 }
 0x375   : > { %p910_p6 = pnand %p909_p13, %p1283_p0 }
 0x376   : > { %p915_p8 = por %p914_p5, %p913_p4 }
 0x377   : > { %p911_p10 = pneg %p910_p6 }
 0x378   : > { %p917_p1 = por %p916_p11, %p915_p8 }
 0x37a   : > { %p918_p3 = pnand %p917_p1, %p911_p10 }
 0x37c   : > { %921 = shalt.err (!%p918_p3)
}
 0x37d   : > { %733 = dma.vmem_to_hbm [thread:$0]  (%p1283_p0), %s1220_s23, 128, %s1218_s9, %s549_s20  }
 0x37e PF: > { %s574_s29 = sand.u32 1, %s952_s24   ;;  %p1284_p7 = scmp.ne.s32.totalorder %s1274_s8, 0 }
 0x37f   : > { %p1285_p9 = scmp.ge.s32.totalorder %s964_s27, 2  ;;  %s575_s30 = scalar_lea.sflag [#allocation4], %s574_s29 }
 0x381   : > { %p747_p12 = pnand %p1285_p9, %p1284_p7 }
 0x383   : > { %947 = dma.done.wait (!%p747_p12), %s575_s30, 128  }
 0x384   : > { %949 = vsyncadd (!%p747_p12), %s575_s30, 4294967168  ;;  %p21_p2 = scmp.ge.s32.totalorder %s1124_s13, 4   ;;  %s1286_s24 = smov %s956_s25 }
 0x385   : > { %s1287_s25 = smov %s960_s26  ;;  %s1288_s26 = smov %s1140_s17 }
 0x386   : > { %s1289_s27 = smov %s1124_s13  ;;  %23 = sbr.rel (!%p21_p2) target bundleno = 6 (0x6), region = 101 }
 0x38d   :  { %580 = vsyncpa [#allocation3], 1 }
 0x38e   :  { %582 = vsyncpa [#allocation3 + $0x1], 1 }
 0x38f   :  { %583 = vsyncpa [#allocation6], 1 }
 0x390   :  { %584 = vsyncpa [#allocation4], 1 }
 0x391   :  { %586 = vsyncpa [#allocation4 + $0x1], 1 }

</bundles_post_ra>
